<compile_context>
chip_gen: v6e
topology: v6e:2x2x1
jax: 0.10.0
libtpu: 0.0.40
codegen_flags: <defaults>
</compile_context>

<pallas_src>
import functools

import jax
import jax.numpy as jnp
from jax.experimental import pallas as pl
from jax.experimental.pallas import tpu as pltpu


def mha_kernel(x1_ref, x2_ref, pad_ref, wq_ref, wkv_ref, wo_ref,
               out_ref, kv_ref, *, num_heads, d_k, causal):
    qi = pl.program_id(1)
    d_model = num_heads * d_k
    t_q = x1_ref.shape[1]
    t_k = kv_ref.shape[0]

    # ---- fused K/V projection, cached per batch element (only at the first q tile) ----
    @pl.when(qi == 0)
    def _():
        x2 = x2_ref[0].astype(jnp.bfloat16)                          # (Tk, D)
        kv = jnp.dot(x2, wkv_ref[...], preferred_element_type=jnp.float32)
        kv_ref[...] = kv.astype(jnp.bfloat16)                        # (Tk, 2D)

    # ---- Q projection (bf16 MXU, f32 accumulate); 1/sqrt(d_k) already folded in WQ ----
    x1 = x1_ref[0].astype(jnp.bfloat16)                              # (TQ, D)
    q = jnp.dot(x1, wq_ref[...],
                preferred_element_type=jnp.float32).astype(jnp.bfloat16)

    # ---- additive mask bias (padding + optional causal), hoisted out of head loop ----
    neg = jnp.float32(-1e30)          # finite: fully-masked rows -> uniform avg, not NaN
    bias = jnp.where(pad_ref[0] != 0, neg, jnp.float32(0.0))         # (1, Tk)
    bias = jnp.broadcast_to(bias, (t_q, t_k))
    if causal:
        row = qi * t_q + jax.lax.broadcasted_iota(jnp.int32, (t_q, t_k), 0)
        col = jax.lax.broadcasted_iota(jnp.int32, (t_q, t_k), 1)
        bias = jnp.where(col > row, neg, bias)

    k = kv_ref[:, :d_model]                                          # (Tk, D) bf16
    v = kv_ref[:, d_model:]                                          # (Tk, D) bf16

    heads = []
    for h in range(num_heads):        # static, small; masks/scale already hoisted
        sl = slice(h * d_k, (h + 1) * d_k)
        s = jax.lax.dot_general(q[:, sl], k[:, sl],
                                (((1,), (1,)), ((), ())),
                                preferred_element_type=jnp.float32)  # (TQ, Tk)
        s = s + bias
        s = s - jnp.max(s, axis=-1, keepdims=True)
        e = jnp.exp(s)
        w = e * pl.reciprocal(jnp.sum(e, axis=-1, keepdims=True), approx=True)
        heads.append(jnp.dot(w.astype(jnp.bfloat16), v[:, sl],
                             preferred_element_type=jnp.float32))    # (TQ, d_k)

    # ---- single output projection: concat(heads) @ WO ----
    ctx = jnp.concatenate(heads, axis=-1).astype(jnp.bfloat16)       # (TQ, D)
    out = jnp.dot(ctx, wo_ref[...], preferred_element_type=jnp.float32)
    out_ref[0] = out.astype(out_ref.dtype)


def multi_head_attention(x1, x2, padding_mask, wq, wk, wv, wo, *,
                         num_heads, lookahead_mask_required=False, tq=None):
    """x1:(B,T1,D) queries, x2:(B,T2,D) keys/values, padding_mask:(B,1,T2) (nonzero=mask)."""
    B, T1, D = x1.shape
    T2 = x2.shape[1]
    assert D % num_heads == 0
    d_k = D // num_heads
    if tq is None:
        tq = T1 if T1 <= 256 else 256
    assert T1 % tq == 0, "T1 must be divisible by the query tile size"
    assert tq == T1 or tq % 8 == 0, "query tile must be a sublane multiple or full T1"
    n_q = T1 // tq

    # bf16 weights (MXU-native, halves resident-weight VMEM); K|V fused into (D, 2D).
    # 1/sqrt(d_k) folded into WQ once (fuses with the cast; one-time (D,D) work).
    wq_b = (wq * (1.0 / (d_k ** 0.5))).astype(jnp.bfloat16)
    wkv_b = jnp.concatenate([wk, wv], axis=1).astype(jnp.bfloat16)
    wo_b = wo.astype(jnp.bfloat16)
    pad_i32 = padding_mask.astype(jnp.int32)

    kernel = functools.partial(mha_kernel, num_heads=num_heads, d_k=d_k,
                               causal=lookahead_mask_required)

    return pl.pallas_call(
        kernel,
        out_shape=jax.ShapeDtypeStruct((B, T1, D), x1.dtype),
        grid=(B, n_q),
        in_specs=[
            pl.BlockSpec((1, tq, D), lambda b, q: (b, q, 0)),   # X1 query tile
            pl.BlockSpec((1, T2, D), lambda b, q: (b, 0, 0)),   # X2 full (reused over q)
            pl.BlockSpec((1, 1, T2), lambda b, q: (b, 0, 0)),   # key padding mask
            pl.BlockSpec((D, D), lambda b, q: (0, 0)),          # WQ (bf16, pre-scaled)
            pl.BlockSpec((D, 2 * D), lambda b, q: (0, 0)),      # WK|WV (bf16, fused)
            pl.BlockSpec((D, D), lambda b, q: (0, 0)),          # WO (bf16)
        ],
        out_specs=pl.BlockSpec((1, tq, D), lambda b, q: (b, q, 0)),
        scratch_shapes=[pltpu.VMEM((T2, 2 * D), jnp.bfloat16)],  # cached K|V
        compiler_params=pltpu.CompilerParams(
            # batch axis -> megacore parallel; query-tile axis carries the K/V cache
            # scratch, so it stays "arbitrary".
            dimension_semantics=("parallel", "arbitrary"),
            vmem_limit_bytes=64 * 1024 * 1024),
    )(x1, x2, pad_i32, wq_b, wkv_b, wo_b)


# ------------------------- pure-JAX reference (for verification) -------------------------
def mha_reference(x1, x2, padding_mask, wq, wk, wv, wo, *, num_heads, causal,
                  matmul_dtype=jnp.float32):
    B, t1, D = x1.shape
    t2 = x2.shape[1]
    dk = D // num_heads

    def mm(a, b):
        return jnp.matmul(a.astype(matmul_dtype), b.astype(matmul_dtype),
                          preferred_element_type=jnp.float32)

    def split(z, t):
        return z.reshape(B, t, num_heads, dk).transpose(0, 2, 1, 3)

    q = split(mm(x1, wq), t1) * (1.0 / dk ** 0.5)
    k = split(mm(x2, wk), t2)
    v = split(mm(x2, wv), t2)
    s = jnp.einsum("bhqd,bhkd->bhqk", q.astype(matmul_dtype), k.astype(matmul_dtype),
                   preferred_element_type=jnp.float32)
    if causal:
        tri = jnp.tril(jnp.ones((t1, t2), jnp.float32))
        s = jnp.where(tri[None, None] == 0, -jnp.inf, s)
    s = jnp.where(padding_mask[:, None, :, :] != 0, -jnp.inf, s)
    w = jax.nn.softmax(s, axis=-1)
    ctx = jnp.einsum("bhqk,bhkd->bhqd", w.astype(matmul_dtype), v.astype(matmul_dtype),
                     preferred_element_type=jnp.float32)
    ctx = ctx.transpose(0, 2, 1, 3).reshape(B, t1, D)
    return mm(ctx, wo)


if __name__ == "__main__":
    B, T, Te, D, H = 2, 16, 24, 128, 4    # batch, query seq, enc seq, d_model, heads
    key = jax.random.PRNGKey(0)
    ks = jax.random.split(key, 6)

    def xavier(k, shape):
        lim = (6.0 / (shape[0] + shape[1])) ** 0.5
        return jax.random.uniform(k, shape, jnp.float32, -lim, lim)

    wq = xavier(ks[0], (D, D))
    wk = xavier(ks[1], (D, D))
    wv = xavier(ks[2], (D, D))
    wo = xavier(ks[3], (D, D))

    x = jax.random.normal(ks[4], (B, T, D), jnp.float32)
    enc = jax.random.normal(ks[5], (B, Te, D), jnp.float32)

    # key-padding masks (1 = masked out); never mask every key of a row.
    pad_self = jnp.zeros((B, 1, T), jnp.int32).at[0, 0, -4:].set(1)
    pad_cross = jnp.zeros((B, 1, Te), jnp.int32).at[1, 0, -3:].set(1)

    # case 1: causal self-attention (lookahead mask required), 2 query tiles of 8
    out1 = jax.block_until_ready(
        multi_head_attention(x, x, pad_self, wq, wk, wv, wo,
                             num_heads=H, lookahead_mask_required=True, tq=8))
    # case 2: cross-attention (keys/values from a different, longer sequence)
    out2 = jax.block_until_ready(
        multi_head_attention(x, enc, pad_cross, wq, wk, wv, wo,
                             num_heads=H, lookahead_mask_required=False, tq=8))

    with jax.default_matmul_precision("highest"):
        ref1_b = mha_reference(x, x, pad_self, wq, wk, wv, wo, num_heads=H,
                               causal=True, matmul_dtype=jnp.bfloat16)
        ref1_f = mha_reference(x, x, pad_self, wq, wk, wv, wo, num_heads=H,
                               causal=True, matmul_dtype=jnp.float32)
        ref2_b = mha_reference(x, enc, pad_cross, wq, wk, wv, wo, num_heads=H,
                               causal=False, matmul_dtype=jnp.bfloat16)
        ref2_f = mha_reference(x, enc, pad_cross, wq, wk, wv, wo, num_heads=H,
                               causal=False, matmul_dtype=jnp.float32)

    assert out1.shape == (B, T, D), out1.shape
    assert out2.shape == (B, T, D), out2.shape
    for name, o, rb, rf in (("self", out1, ref1_b, ref1_f),
                            ("cross", out2, ref2_b, ref2_f)):
        err_b = float(jnp.max(jnp.abs(o - rb)))
        err_f = float(jnp.max(jnp.abs(o - rf)))
        # strict check vs a reference using the same bf16 matmul precision
        assert jnp.allclose(o, rb, atol=3e-2, rtol=3e-2), f"{name}: bf16-ref err {err_b}"
        # loose semantic check vs the full-f32 torch-equivalent reference
        assert jnp.allclose(o, rf, atol=2.5e-1, rtol=2.5e-1), f"{name}: f32-ref err {err_f}"
    print("KERNEL_OK")
</pallas_src>

<mosaic_0001>
module attributes {stable_mosaic.version = 11 : i64} {
  func.func @mha_kernel(%arg0: i32, %arg1: i32, %arg2: memref<1x8x128xf32, #tpu.memory_space<vmem>>, %arg3: memref<1x16x128xf32, #tpu.memory_space<vmem>>, %arg4: memref<1x1x16xi32, #tpu.memory_space<vmem>>, %arg5: memref<128x128xbf16, #tpu.memory_space<vmem>>, %arg6: memref<128x256xbf16, #tpu.memory_space<vmem>>, %arg7: memref<128x128xbf16, #tpu.memory_space<vmem>>, %arg8: memref<1x8x128xf32, #tpu.memory_space<vmem>>, %arg9: memref<16x256xbf16, #tpu.memory_space<vmem>>) attributes {dimension_semantics = [#tpu.dimension_semantics<parallel>, #tpu.dimension_semantics<arbitrary>], iteration_bounds = array<i64: 2, 2>, scalar_prefetch = 0 : i64, scratch_operands = 1 : i64, tpu.core_type = #tpu.core_type<tc>, window_params = [{transform_indices = @transform_0, window_bounds = array<i64: 1, 8, 128>}, {transform_indices = @transform_1, window_bounds = array<i64: 1, 16, 128>}, {transform_indices = @transform_2, window_bounds = array<i64: 1, 1, 16>}, {pipeline_mode = #tpu.pipeline_mode<synchronous>, transform_indices = @transform_3, window_bounds = array<i64: 128, 128>}, {pipeline_mode = #tpu.pipeline_mode<synchronous>, transform_indices = @transform_4, window_bounds = array<i64: 128, 256>}, {pipeline_mode = #tpu.pipeline_mode<synchronous>, transform_indices = @transform_5, window_bounds = array<i64: 128, 128>}, {transform_indices = @transform_6, window_bounds = array<i64: 1, 8, 128>}]} {
    %c0_i32 = arith.constant 0 : i32
    %0 = arith.cmpi eq, %arg1, %c0_i32 : i32
    %1 = arith.extui %0 : i1 to i32
    %c0_i32_0 = arith.constant 0 : i32
    %2 = arith.cmpi ne, %1, %c0_i32_0 : i32
    scf.if %2 {
      %c0_37 = arith.constant 0 : index
      %c0_38 = arith.constant 0 : index
      %c0_39 = arith.constant 0 : index
      %103 = vector.load %arg3[%c0_37, %c0_38, %c0_39] : memref<1x16x128xf32, #tpu.memory_space<vmem>>, vector<1x16x128xf32>
      %104 = vector.shape_cast %103 : vector<1x16x128xf32> to vector<16x128xf32>
      %105 = arith.truncf %104 : vector<16x128xf32> to vector<16x128xbf16>
      %c0_40 = arith.constant 0 : index
      %c0_41 = arith.constant 0 : index
      %106 = vector.load %arg6[%c0_40, %c0_41] : memref<128x256xbf16, #tpu.memory_space<vmem>>, vector<128x256xbf16>
      %cst_42 = arith.constant dense<0.000000e+00> : vector<16x256xf32>
      %107 = tpu.matmul %105, %106, %cst_42 {dimension_numbers = #tpu.dot_dimension_numbers<[1], [0], [0], [1], [0, 0, 1, 1], [], []>} : vector<16x128xbf16>, vector<128x256xbf16>, vector<16x256xf32> -> vector<16x256xf32>
      %108 = arith.truncf %107 : vector<16x256xf32> to vector<16x256xbf16>
      %c0_43 = arith.constant 0 : index
      %c0_44 = arith.constant 0 : index
      %109 = vector.load %arg9[%c0_43, %c0_44] : memref<16x256xbf16, #tpu.memory_space<vmem>>, vector<16x256xbf16>
      tpu.vector_store %arg9[%c0_43, %c0_44], %108 {strides = array<i32>} : memref<16x256xbf16, #tpu.memory_space<vmem>>, vector<16x256xbf16>,
    } else {
    }
    %c0 = arith.constant 0 : index
    %c0_1 = arith.constant 0 : index
    %c0_2 = arith.constant 0 : index
    %3 = vector.load %arg2[%c0, %c0_1, %c0_2] : memref<1x8x128xf32, #tpu.memory_space<vmem>>, vector<1x8x128xf32>
    %4 = vector.shape_cast %3 : vector<1x8x128xf32> to vector<8x128xf32>
    %5 = arith.truncf %4 : vector<8x128xf32> to vector<8x128xbf16>
    %c0_3 = arith.constant 0 : index
    %c0_4 = arith.constant 0 : index
    %6 = vector.load %arg5[%c0_3, %c0_4] : memref<128x128xbf16, #tpu.memory_space<vmem>>, vector<128x128xbf16>
    %cst = arith.constant dense<0.000000e+00> : vector<8x128xf32>
    %7 = tpu.matmul %5, %6, %cst {dimension_numbers = #tpu.dot_dimension_numbers<[1], [0], [0], [1], [0, 0, 1, 1], [], []>} : vector<8x128xbf16>, vector<128x128xbf16>, vector<8x128xf32> -> vector<8x128xf32>
    %8 = arith.truncf %7 : vector<8x128xf32> to vector<8x128xbf16>
    %c0_5 = arith.constant 0 : index
    %c0_6 = arith.constant 0 : index
    %c0_7 = arith.constant 0 : index
    %9 = vector.load %arg4[%c0_5, %c0_6, %c0_7] : memref<1x1x16xi32, #tpu.memory_space<vmem>>, vector<1x1x16xi32>
    %10 = vector.shape_cast %9 : vector<1x1x16xi32> to vector<1x16xi32>
    %c0_i32_8 = arith.constant 0 : i32
    %11 = vector.broadcast %c0_i32_8 : i32 to vector<1x16xi32>
    %12 = arith.cmpi ne, %10, %11 : vector<1x16xi32>
    %cst_9 = arith.constant -1.000000e+30 : f32
    %cst_10 = arith.constant 0.000000e+00 : f32
    %13 = vector.broadcast %cst_9 : f32 to vector<1x16xf32>
    %14 = vector.broadcast %cst_10 : f32 to vector<1x16xf32>
    %15 = arith.select %12, %13, %14 : vector<1x16xi1>, vector<1x16xf32>
    %16 = vector.shape_cast %15 : vector<1x16xf32> to vector<1x16xf32>
    %17 = vector.broadcast %16 : vector<1x16xf32> to vector<8x16xf32>
    %c8_i32 = arith.constant 8 : i32
    %18 = arith.muli %arg1, %c8_i32 : i32
    %19 = tpu.iota {dimensions = array<i32: 0>} : vector<8x16xi32>
    %20 = vector.broadcast %18 : i32 to vector<8x16xi32>
    %21 = arith.addi %20, %19 : vector<8x16xi32>
    %22 = tpu.iota {dimensions = array<i32: 1>} : vector<8x16xi32>
    %23 = arith.cmpi sgt, %22, %21 : vector<8x16xi32>
    %cst_11 = arith.constant -1.000000e+30 : f32
    %24 = vector.broadcast %cst_11 : f32 to vector<8x16xf32>
    %25 = arith.select %23, %24, %17 : vector<8x16xi1>, vector<8x16xf32>
    %c0_12 = arith.constant 0 : index
    %c0_13 = arith.constant 0 : index
    %26 = vector.load %arg9[%c0_12, %c0_13] : memref<16x256xbf16, #tpu.memory_space<vmem>>, vector<16x128xbf16>
    %c0_14 = arith.constant 0 : index
    %c128 = arith.constant 128 : index
    %27 = vector.load %arg9[%c0_14, %c128] : memref<16x256xbf16, #tpu.memory_space<vmem>>, vector<16x128xbf16>
    %28 = vector.extract_strided_slice %8 {offsets = [0, 0], sizes = [8, 32], strides = [1, 1]} : vector<8x128xbf16> to vector<8x32xbf16>
    %29 = vector.extract_strided_slice %26 {offsets = [0, 0], sizes = [16, 32], strides = [1, 1]} : vector<16x128xbf16> to vector<16x32xbf16>
    %cst_15 = arith.constant dense<0.000000e+00> : vector<8x16xf32>
    %30 = tpu.matmul %28, %29, %cst_15 {dimension_numbers = #tpu.dot_dimension_numbers<[1], [1], [0], [0], [0, 0, 1, 0], [], []>} : vector<8x32xbf16>, vector<16x32xbf16>, vector<8x16xf32> -> vector<8x16xf32>
    %31 = arith.addf %30, %25 : vector<8x16xf32>
    %cst_16 = arith.constant dense<0xFF800000> : vector<8xf32>
    %32 = vector.multi_reduction <maximumf>, %31, %cst_16 [1] : vector<8x16xf32> to vector<8xf32>
    %33 = vector.shape_cast %32 : vector<8xf32> to vector<8x1xf32>
    %34 = vector.broadcast %33 : vector<8x1xf32> to vector<8x16xf32>
    %35 = arith.subf %31, %34 : vector<8x16xf32>
    %36 = math.exp %35 : vector<8x16xf32>
    %cst_17 = arith.constant dense<0.000000e+00> : vector<8xf32>
    %37 = vector.multi_reduction <add>, %36, %cst_17 [1] : vector<8x16xf32> to vector<8xf32>
    %38 = vector.shape_cast %37 : vector<8xf32> to vector<8x1xf32>
    %39 = tpu.reciprocal %38 {approx = true} : vector<8x1xf32> -> vector<8x1xf32>
    %40 = vector.broadcast %39 : vector<8x1xf32> to vector<8x16xf32>
    %41 = arith.mulf %36, %40 : vector<8x16xf32>
    %42 = arith.truncf %41 : vector<8x16xf32> to vector<8x16xbf16>
    %43 = vector.extract_strided_slice %27 {offsets = [0, 0], sizes = [16, 32], strides = [1, 1]} : vector<16x128xbf16> to vector<16x32xbf16>
    %cst_18 = arith.constant dense<0.000000e+00> : vector<8x32xf32>
    %44 = tpu.matmul %42, %43, %cst_18 {dimension_numbers = #tpu.dot_dimension_numbers<[1], [0], [0], [1], [0, 0, 1, 1], [], []>} : vector<8x16xbf16>, vector<16x32xbf16>, vector<8x32xf32> -> vector<8x32xf32>
    %45 = vector.extract_strided_slice %8 {offsets = [0, 32], sizes = [8, 32], strides = [1, 1]} : vector<8x128xbf16> to vector<8x32xbf16>
    %46 = vector.extract_strided_slice %26 {offsets = [0, 32], sizes = [16, 32], strides = [1, 1]} : vector<16x128xbf16> to vector<16x32xbf16>
    %cst_19 = arith.constant dense<0.000000e+00> : vector<8x16xf32>
    %47 = tpu.matmul %45, %46, %cst_19 {dimension_numbers = #tpu.dot_dimension_numbers<[1], [1], [0], [0], [0, 0, 1, 0], [], []>} : vector<8x32xbf16>, vector<16x32xbf16>, vector<8x16xf32> -> vector<8x16xf32>
    %48 = arith.addf %47, %25 : vector<8x16xf32>
    %cst_20 = arith.constant dense<0xFF800000> : vector<8xf32>
    %49 = vector.multi_reduction <maximumf>, %48, %cst_20 [1] : vector<8x16xf32> to vector<8xf32>
    %50 = vector.shape_cast %49 : vector<8xf32> to vector<8x1xf32>
    %51 = vector.broadcast %50 : vector<8x1xf32> to vector<8x16xf32>
    %52 = arith.subf %48, %51 : vector<8x16xf32>
    %53 = math.exp %52 : vector<8x16xf32>
    %cst_21 = arith.constant dense<0.000000e+00> : vector<8xf32>
    %54 = vector.multi_reduction <add>, %53, %cst_21 [1] : vector<8x16xf32> to vector<8xf32>
    %55 = vector.shape_cast %54 : vector<8xf32> to vector<8x1xf32>
    %56 = tpu.reciprocal %55 {approx = true} : vector<8x1xf32> -> vector<8x1xf32>
    %57 = vector.broadcast %56 : vector<8x1xf32> to vector<8x16xf32>
    %58 = arith.mulf %53, %57 : vector<8x16xf32>
    %59 = arith.truncf %58 : vector<8x16xf32> to vector<8x16xbf16>
    %60 = vector.extract_strided_slice %27 {offsets = [0, 32], sizes = [16, 32], strides = [1, 1]} : vector<16x128xbf16> to vector<16x32xbf16>
    %cst_22 = arith.constant dense<0.000000e+00> : vector<8x32xf32>
    %61 = tpu.matmul %59, %60, %cst_22 {dimension_numbers = #tpu.dot_dimension_numbers<[1], [0], [0], [1], [0, 0, 1, 1], [], []>} : vector<8x16xbf16>, vector<16x32xbf16>, vector<8x32xf32> -> vector<8x32xf32>
    %62 = vector.extract_strided_slice %8 {offsets = [0, 64], sizes = [8, 32], strides = [1, 1]} : vector<8x128xbf16> to vector<8x32xbf16>
    %63 = vector.extract_strided_slice %26 {offsets = [0, 64], sizes = [16, 32], strides = [1, 1]} : vector<16x128xbf16> to vector<16x32xbf16>
    %cst_23 = arith.constant dense<0.000000e+00> : vector<8x16xf32>
    %64 = tpu.matmul %62, %63, %cst_23 {dimension_numbers = #tpu.dot_dimension_numbers<[1], [1], [0], [0], [0, 0, 1, 0], [], []>} : vector<8x32xbf16>, vector<16x32xbf16>, vector<8x16xf32> -> vector<8x16xf32>
    %65 = arith.addf %64, %25 : vector<8x16xf32>
    %cst_24 = arith.constant dense<0xFF800000> : vector<8xf32>
    %66 = vector.multi_reduction <maximumf>, %65, %cst_24 [1] : vector<8x16xf32> to vector<8xf32>
    %67 = vector.shape_cast %66 : vector<8xf32> to vector<8x1xf32>
    %68 = vector.broadcast %67 : vector<8x1xf32> to vector<8x16xf32>
    %69 = arith.subf %65, %68 : vector<8x16xf32>
    %70 = math.exp %69 : vector<8x16xf32>
    %cst_25 = arith.constant dense<0.000000e+00> : vector<8xf32>
    %71 = vector.multi_reduction <add>, %70, %cst_25 [1] : vector<8x16xf32> to vector<8xf32>
    %72 = vector.shape_cast %71 : vector<8xf32> to vector<8x1xf32>
    %73 = tpu.reciprocal %72 {approx = true} : vector<8x1xf32> -> vector<8x1xf32>
    %74 = vector.broadcast %73 : vector<8x1xf32> to vector<8x16xf32>
    %75 = arith.mulf %70, %74 : vector<8x16xf32>
    %76 = arith.truncf %75 : vector<8x16xf32> to vector<8x16xbf16>
    %77 = vector.extract_strided_slice %27 {offsets = [0, 64], sizes = [16, 32], strides = [1, 1]} : vector<16x128xbf16> to vector<16x32xbf16>
    %cst_26 = arith.constant dense<0.000000e+00> : vector<8x32xf32>
    %78 = tpu.matmul %76, %77, %cst_26 {dimension_numbers = #tpu.dot_dimension_numbers<[1], [0], [0], [1], [0, 0, 1, 1], [], []>} : vector<8x16xbf16>, vector<16x32xbf16>, vector<8x32xf32> -> vector<8x32xf32>
    %79 = vector.extract_strided_slice %8 {offsets = [0, 96], sizes = [8, 32], strides = [1, 1]} : vector<8x128xbf16> to vector<8x32xbf16>
    %80 = vector.extract_strided_slice %26 {offsets = [0, 96], sizes = [16, 32], strides = [1, 1]} : vector<16x128xbf16> to vector<16x32xbf16>
    %cst_27 = arith.constant dense<0.000000e+00> : vector<8x16xf32>
    %81 = tpu.matmul %79, %80, %cst_27 {dimension_numbers = #tpu.dot_dimension_numbers<[1], [1], [0], [0], [0, 0, 1, 0], [], []>} : vector<8x32xbf16>, vector<16x32xbf16>, vector<8x16xf32> -> vector<8x16xf32>
    %82 = arith.addf %81, %25 : vector<8x16xf32>
    %cst_28 = arith.constant dense<0xFF800000> : vector<8xf32>
    %83 = vector.multi_reduction <maximumf>, %82, %cst_28 [1] : vector<8x16xf32> to vector<8xf32>
    %84 = vector.shape_cast %83 : vector<8xf32> to vector<8x1xf32>
    %85 = vector.broadcast %84 : vector<8x1xf32> to vector<8x16xf32>
    %86 = arith.subf %82, %85 : vector<8x16xf32>
    %87 = math.exp %86 : vector<8x16xf32>
    %cst_29 = arith.constant dense<0.000000e+00> : vector<8xf32>
    %88 = vector.multi_reduction <add>, %87, %cst_29 [1] : vector<8x16xf32> to vector<8xf32>
    %89 = vector.shape_cast %88 : vector<8xf32> to vector<8x1xf32>
    %90 = tpu.reciprocal %89 {approx = true} : vector<8x1xf32> -> vector<8x1xf32>
    %91 = vector.broadcast %90 : vector<8x1xf32> to vector<8x16xf32>
    %92 = arith.mulf %87, %91 : vector<8x16xf32>
    %93 = arith.truncf %92 : vector<8x16xf32> to vector<8x16xbf16>
    %94 = vector.extract_strided_slice %27 {offsets = [0, 96], sizes = [16, 32], strides = [1, 1]} : vector<16x128xbf16> to vector<16x32xbf16>
    %cst_30 = arith.constant dense<0.000000e+00> : vector<8x32xf32>
    %95 = tpu.matmul %93, %94, %cst_30 {dimension_numbers = #tpu.dot_dimension_numbers<[1], [0], [0], [1], [0, 0, 1, 1], [], []>} : vector<8x16xbf16>, vector<16x32xbf16>, vector<8x32xf32> -> vector<8x32xf32>
    %96 = tpu.concatenate %44, %61, %78, %95 in 1 : vector<8x32xf32>, vector<8x32xf32>, vector<8x32xf32>, vector<8x32xf32> -> vector<8x128xf32>
    %97 = arith.truncf %96 : vector<8x128xf32> to vector<8x128xbf16>
    %c0_31 = arith.constant 0 : index
    %c0_32 = arith.constant 0 : index
    %98 = vector.load %arg7[%c0_31, %c0_32] : memref<128x128xbf16, #tpu.memory_space<vmem>>, vector<128x128xbf16>
    %cst_33 = arith.constant dense<0.000000e+00> : vector<8x128xf32>
    %99 = tpu.matmul %97, %98, %cst_33 {dimension_numbers = #tpu.dot_dimension_numbers<[1], [0], [0], [1], [0, 0, 1, 1], [], []>} : vector<8x128xbf16>, vector<128x128xbf16>, vector<8x128xf32> -> vector<8x128xf32>
    %c0_34 = arith.constant 0 : index
    %c0_35 = arith.constant 0 : index
    %c0_36 = arith.constant 0 : index
    %100 = vector.load %arg8[%c0_34, %c0_35, %c0_36] : memref<1x8x128xf32, #tpu.memory_space<vmem>>, vector<1x8x128xf32>
    %101 = vector.shape_cast %100 : vector<1x8x128xf32> to vector<8x128xf32>
    %102 = vector.shape_cast %99 : vector<8x128xf32> to vector<1x8x128xf32>
    tpu.vector_store %arg8[%c0_34, %c0_35, %c0_36], %102 {strides = array<i32>} : memref<1x8x128xf32, #tpu.memory_space<vmem>>, vector<1x8x128xf32>,
    return
  }
  func.func @transform_0(%arg0: i32, %arg1: i32) -> (i32, i32, i32) {
    %c0_i32 = arith.constant 0 : i32
    %c0_i32_0 = arith.constant 0 : i32
    return %arg0, %arg1, %c0_i32 : i32, i32, i32
  }
  func.func @transform_1(%arg0: i32, %arg1: i32) -> (i32, i32, i32) {
    %c0_i32 = arith.constant 0 : i32
    %c0_i32_0 = arith.constant 0 : i32
    %c0_i32_1 = arith.constant 0 : i32
    return %arg0, %c0_i32, %c0_i32_0 : i32, i32, i32
  }
  func.func @transform_2(%arg0: i32, %arg1: i32) -> (i32, i32, i32) {
    %c0_i32 = arith.constant 0 : i32
    %c0_i32_0 = arith.constant 0 : i32
    %c0_i32_1 = arith.constant 0 : i32
    return %arg0, %c0_i32, %c0_i32_0 : i32, i32, i32
  }
  func.func @transform_3(%arg0: i32, %arg1: i32) -> (i32, i32) {
    %c0_i32 = arith.constant 0 : i32
    %c0_i32_0 = arith.constant 0 : i32
    %c0_i32_1 = arith.constant 0 : i32
    return %c0_i32, %c0_i32_0 : i32, i32
  }
  func.func @transform_4(%arg0: i32, %arg1: i32) -> (i32, i32) {
    %c0_i32 = arith.constant 0 : i32
    %c0_i32_0 = arith.constant 0 : i32
    %c0_i32_1 = arith.constant 0 : i32
    return %c0_i32, %c0_i32_0 : i32, i32
  }
  func.func @transform_5(%arg0: i32, %arg1: i32) -> (i32, i32) {
    %c0_i32 = arith.constant 0 : i32
    %c0_i32_0 = arith.constant 0 : i32
    %c0_i32_1 = arith.constant 0 : i32
    return %c0_i32, %c0_i32_0 : i32, i32
  }
  func.func @transform_6(%arg0: i32, %arg1: i32) -> (i32, i32, i32) {
    %c0_i32 = arith.constant 0 : i32
    %c0_i32_0 = arith.constant 0 : i32
    return %arg0, %arg1, %c0_i32 : i32, i32, i32
  }
}

</mosaic_0001>

<bundles_post_ra>
// kernel: tpu_custom_call.1
= control target key start
LH: loop header
LB: loop body
LE: loop exit
PB: predicated region body
PF: predicated region fallthrough
CT: control target
= control target key end

     0   :  { %s2549_s0 = inlined_call_operand.hbm [shape: f32[2,16,128], index: 0, kind: input, shape index: {}]   ;;  %s2550_s1 = inlined_call_operand.hbm [shape: f32[2,16,128], index: 1, kind: input, shape index: {}]   ;;  %s2551_s2 = inlined_call_operand.vmem [shape: s32[2,1,16], index: 2, kind: input, shape index: {}]   ;;  %s2552_s3 = inlined_call_operand.hbm [shape: bf16[128,128], index: 3, kind: input, shape index: {}]   ;;  %s2553_s4 = inlined_call_operand.hbm [shape: bf16[128,256], index: 4, kind: input, shape index: {}]   ;;  %s2554_s5 = inlined_call_operand.hbm [shape: bf16[128,128], index: 5, kind: input, shape index: {}]   ;;  %s2555_s6 = inlined_call_operand.hbm [shape: f32[2,16,128], index: 6, kind: output, shape index: {}]  }
   0x1   :  { %2569 = sst [smem:[#allocation25_spill]] %s2549_s0 }
   0x2   :  { %2570 = sst [smem:[#allocation26_spill]] %s2551_s2 }
   0x3   :  { %2571 = sst [smem:[#allocation27_spill]] %s2552_s3 }
   0x4   :  { %2572 = sst [smem:[#allocation28_spill]] %s2553_s4 }
   0x5   :  { %2573 = sst [smem:[#allocation29_spill]] %s2554_s5 }
   0x6   :  { %2574 = sst [smem:[#allocation30_spill]] %s2555_s6 }
   0x7   :  { %11 = vsyncpa [#allocation4], 0 }
   0x8   :  { %13 = vsyncpa [#allocation4 + $0x1], 0 }
   0x9   :  { %14 = vsyncpa [#allocation7], 0 }
   0xa   :  { %16 = vsyncpa [#allocation7 + $0x1], 0 }
   0xb   :  { %17 = vsyncpa [#allocation10], 0 }
   0xc   :  { %18 = vsyncpa [#allocation5], 0 }
   0xd   :  { %20 = vsyncpa [#allocation5 + $0x1], 0  ;;  %s2116_s21 = smov 0   ;;  %s2118_s22 = smov 0  }
   0xe   :  { %s2120_s23 = smov 0   ;;  %s2122_s24 = smov 0  }
   0xf   :  { %s2124_s25 = smov 0   ;;  %s2126_s26 = smov 0  }
  0x10   :  { %s2128_s27 = smov 0   ;;  %s2130_s28 = smov 0  }
  0x11   :  { %s2132_s29 = smov 0   ;;  %s2134_s30 = smov 0  }
  0x12   :  { %s2136_s7 = smov 0  }
  0x13 LB: > { %2575 = sst [smem:[#allocation18_spill]] %s2047_s27  ;;  %s2170_s8 = sadd.s32 4294967295, %s2063_s7   ;;  %s2063_s7 = sphi %s2136_s7, %s26_s7   ;;  %s2059_s30 = sphi %s2134_s30, %s2624_s30   ;;  %s2055_s29 = sphi %s2132_s29, %s2615_s29   ;;  %s2051_s28 = sphi %s2130_s28, %s2623_s28   ;;  %s2047_s27 = sphi %s2128_s27, %s2614_s27   ;;  %s2043_s26 = sphi %s2126_s26, %s2622_s26   ;;  %s2039_s25 = sphi %s2124_s25, %s2621_s25   ;;  %s2035_s24 = sphi %s2122_s24, %s2620_s24   ;;  %s2031_s23 = sphi %s2120_s23, %s2619_s23   ;;  %s2027_s22 = sphi %s2118_s22, %s2618_s22   ;;  %s2023_s21 = sphi %s2116_s21, %s2617_s21  }
  0x14   : > { %2576 = sst [smem:[#allocation19_spill]] %s2055_s29  ;;  %p86_p0 = scmp.ne.s32.totalorder %s2027_s22, %s2023_s21 }
  0x15   : > { %p2561_p1 = scmp.eq.s32.totalorder %s2170_s8, 0  ;;  %p1397_p2 = scmp.ge.s32.totalorder %s2063_s7, 1 }
  0x16   : > { %p214_p3 = scmp.lt.s32.totalorder %s2063_s7, 5  ;;  %s2065_s11 = smov [#allocation8]  }
  0x17   : > { %p2178_p4 = por %p86_p0, %p2561_p1  ;;  %s226_s12 = sshll.u32 %s2065_s11, 4  ;;  %s227_s12 = int_to_ptr.vmem [resolvable:$true] %s226_s12 }
  0x18   : > { %p2182_p5 = pnand %p1397_p2, %p214_p3  ;;  %s2066_s14 = smov [#allocation9]  }
  0x19   : > { %s2577_s9 = scalar_select %p2178_p4, 1, 0 }
  0x1a   : > { %p1609_p6 = pneg %p2182_p5  ;;  %s239_s15 = sshll.u32 %s2066_s14, 4  ;;  %s240_s15 = int_to_ptr.vmem [resolvable:$true] %s239_s15 }
  0x1b   : > { %s1808_s16 = scalar_lea.vmem %s227_s12, 1024  ;;  %p1816_p12 = scmp.lt.s32.totalorder %s227_s12, %s227_s12 }
  0x1c   : > { %p2190_p7 = pnand %p1609_p6, %p2561_p1  ;;  %p1809_p9 = scmp.ne.s32.totalorder %s227_s12, %s1808_s16 }
  0x1d   : > { %p1817_p13 = scmp.lt.s32.totalorder %s1808_s16, %s1808_s16 }
  0x1e   : > { %p1799_p8 = pneg %p2190_p7 }
  0x1f   : > { %p1818_p0 = por %p1817_p13, %p1816_p12 }
  0x20   : > { %p1811_p10 = pnand %p1809_p9, %p1799_p8 }
  0x22   : > { %p1812_p11 = pneg %p1811_p10 }
  0x24   : > { %p1819_p2 = pnand %p1818_p0, %p1812_p11 }
  0x26   : > { %1822 = shalt.err (!%p1819_p2)
}
  0x27   : > { %s2556_s17 = smov 64   ;;  %s2068_s18 = smov 4  }
  0x28   : > { %s2580_s3 = sld [smem:[#allocation27_spill]]  ;;  %s1834_s21 = scalar_lea.vmem %s240_s15, 2048 }
  0x29   : > { %p1835_p3 = scmp.ne.s32.totalorder %s240_s15, %s1834_s21  ;;  %p1842_p10 = scmp.lt.s32.totalorder %s240_s15, %s240_s15 }
  0x2a   : > { %p1843_p11 = scmp.lt.s32.totalorder %s1834_s21, %s1834_s21 }
  0x2b   : > { %p1837_p6 = pnand %p1835_p3, %p1799_p8 }
  0x2c   : > { %p1844_p12 = por %p1843_p11, %p1842_p10 }
  0x2d   : > { %p1838_p9 = pneg %p1837_p6 }
  0x2e   : > { %1612 = dma.hbm_to_vmem [thread:$0]  (!%p2190_p7), %s2580_s3, 1024, %s227_s12, [#allocation7], %s2556_s17, %s2556_s17, %s2068_s18  }
  0x2f   : > { %p1845_p13 = pnand %p1844_p12, %p1838_p9 }
  0x31   : > { %1848 = shalt.err (!%p1845_p13)
}
  0x32   : > { %s2557_s11 = smov 128   ;;  %s2558_s14 = smov 8  }
  0x33   : > { %s2581_s4 = sld [smem:[#allocation28_spill]]  ;;  %s2071_s19 = smov [#allocation11]  }
  0x34   : > { %s252_s20 = sshll.u32 %s2071_s19, 4  ;;  %s253_s20 = int_to_ptr.vmem [resolvable:$true] %s252_s20 }
  0x35   : > { %s1860_s17 = scalar_lea.vmem %s253_s20, 1024  ;;  %p1868_p6 = scmp.lt.s32.totalorder %s253_s20, %s253_s20 }
  0x36   : > { %p1861_p0 = scmp.ne.s32.totalorder %s253_s20, %s1860_s17  ;;  %p1869_p9 = scmp.lt.s32.totalorder %s1860_s17, %s1860_s17 }
  0x38   : > { %p1863_p2 = pnand %p1861_p0, %p1799_p8  ;;  %p1870_p10 = por %p1869_p9, %p1868_p6 }
  0x39   : > { %1615 = dma.hbm_to_vmem [thread:$0]  (!%p2190_p7), %s2581_s4, 2048, %s240_s15, [#allocation10], %s2557_s11, %s2557_s11, %s2558_s14  }
  0x3a   : > { %p1864_p3 = pneg %p1863_p2 }
  0x3c   : > { %p1871_p11 = pnand %p1870_p10, %p1864_p3 }
  0x3e   : > { %1874 = shalt.err (!%p1871_p11)
}
  0x3f   : > { %s2582_s21 = smov 64   ;;  %s2583_s5 = sld [smem:[#allocation29_spill]] }
  0x40   : > { %s1396_s13 = sadd.s32 4294967294, %s2063_s7   ;;  %s35_s17 = sadd.s32 1, %s2055_s29 }
  0x41   : > { %s38_s16 = sadd.s32 1, %s2059_s30  ;;  %p36_p8 = scmp.ge.s32.totalorder %s35_s17, 2 }
  0x42   : > { %s47_s19 = sadd.s32 1, %s2043_s26  ;;  %p54_p12 = scmp.ne.s32.totalorder %s2043_s26, %s2039_s25 }
  0x43   : > { %p55_p13 = scmp.eq.s32.totalorder %s2063_s7, 0  ;;  %s2626_s17 = smov (%p36_p8, %s35_s17), 0 }
  0x44   : > { %2584 = sst [smem:[#allocation20_spill]] %s2626_s17  ;;  %s2628_s16 = smov (!%p36_p8, %s38_s16), %s2059_s30 }
  0x45   : > { %1618 = dma.hbm_to_vmem [thread:$0]  (!%p2190_p7), %s2583_s5, 1024, %s253_s20, [#allocation10], %s2582_s21, %s2582_s21, %s2068_s18  }
  0x46   : > { %s43_s18 = ssub.s32 %s2055_s29, %s2626_s17  ;;  %p2244_p7 = por %p55_p13, %p54_p12 }
  0x47   : > { %p40_p0 = scmp.ge.s32.totalorder %s2628_s16, 2  ;;  %p60_p2 = scmp.ne.s32.totalorder %s2039_s25, %s2035_s24 }
  0x48   : > { %s73_s21 = sadd.s32 1, %s2031_s23  ;;  %p80_p3 = scmp.ne.s32.totalorder %s2031_s23, %s2027_s22 }
  0x49   : > { %s2630_s16 = smov (%p40_p0, %s2628_s16), 0  ;;  %p2260_p6 = por %p2561_p1, %p60_p2 }
  0x4a   : > { %2586 = sst [smem:[#allocation21_spill]] %s2630_s16  ;;  %p2264_p9 = por %p80_p3, %p55_p13 }
  0x4b   : > { %s42_s11 = ssub.s32 %s2059_s30, %s2630_s16  ;;  %p201_p10 = scmp.eq.s32.totalorder %s2170_s8, 3 }
  0x4c   : > { %s44_s14 = sor.u32 %s43_s18, %s42_s11  ;;  %p71_p11 = scmp.eq.s32.totalorder %s42_s11, 0 }
  0x4d   : > { %p45_p8 = scmp.eq.s32.totalorder %s44_s14, 0  ;;  %p2274_p0 = por %p201_p10, %p54_p12 }
  0x4e   : > { %s2279_s4 = scalar_select %p71_p11, %s2031_s23, %s73_s21  }
  0x4f   : > { %s2589_s3 = scalar_select %p2274_p0, 1, 0 }
  0x50   : > { %2591 = sst [smem:[#allocation23_spill]] %s2279_s4  ;;  %p207_p13 = scmp.eq.s32.totalorder %s1396_s13, 3 }
  0x51   : > { %2590 = sst [smem:[#allocation22_spill]] %s2589_s3  ;;  %p1633_p3 = scmp.lt.s32.totalorder %s2063_s7, 4 }
  0x52   : > { %s2282_s5 = scalar_select %p45_p8, %s2043_s26, %s47_s19  }
  0x53   : > { %s266_s17 = sand.u32 1, %s2043_s26   ;;  %s1403_s16 = sshll.u32 %s2059_s30, 1 }
  0x54   : > { %2592 = sst [smem:[#allocation24_spill]] %s2282_s5  ;;  %p2290_p1 = por %p207_p13, %p60_p2 }
  0x55   : > { %s1402_s14 = sshll.u32 %s266_s17, 3  ;;  %s275_s18 = sadd.s32 %s2055_s29, %s1403_s16 }
  0x56   : > { %s2593_s11 = scalar_select %p2290_p1, 1, 0 }
  0x57   : > { %s1404_s6 = sshll.u32 %s275_s18, 7  ;;  %s2594_s0 = sld [smem:[#allocation25_spill]] }
  0x58   : > { %s270_s4 = scalar_lea.vmem [#allocation3], %s1402_s14  ;;  %p2300_p12 = pnand %p1633_p3, %p2244_p7 }
  0x59   : > { %s279_s2 = sshll.u32 %s270_s4, 4  ;;  %p2306_p2 = pnand %p1633_p3, %p2264_p9  ;;  %s280_s2 = int_to_ptr.vmem [resolvable:$true] %s279_s2 }
  0x5a   : > { %s286_s16 = sand.u32 1, %s2063_s7   ;;  %s267_s18 = scalar_lea.sflag [#allocation4], %s266_s17 }
  0x5b   : > { %p1877_p10 = pneg %p2300_p12  ;;  %s1888_s3 = scalar_lea.vmem %s280_s2, 128 }
  0x5c   : > { %p1889_p11 = scmp.ne.s32.totalorder %s280_s2, %s1888_s3  ;;  %s2072_s4 = smov [#allocation3]  }
  0x5d   : > { %s277_s21 = scalar_lea.hbm %s2594_s0, %s1404_s6  ;;  %s1893_s6 = sshll.u32 %s2072_s4, 4  ;;  %s1894_s6 = int_to_ptr.vmem [resolvable:$false] %s1893_s6 }
  0x5e   : > { %p1891_p8 = pnand %p1889_p11, %p1877_p10  ;;  %s1895_s27 = scalar_lea.vmem %s1894_s6, 256 }
  0x5f   : > { %p1896_p7 = scmp.lt.s32.totalorder %s280_s2, %s1894_s6  ;;  %p1897_p1 = scmp.lt.s32.totalorder %s1895_s27, %s1888_s3 }
  0x60   : > { %p1892_p13 = pneg %p1891_p8 }
  0x61   : > { %p1898_p0 = por %p1897_p1, %p1896_p7 }
  0x63   : > { %p1899_p4 = pnand %p1898_p0, %p1892_p13 }
  0x65   : > { %1902 = shalt.err (!%p1899_p4)
}
  0x66   : > { %1622 = dma.hbm_to_vmem [thread:$0]  (!%p2300_p12), %s277_s21, 128, %s280_s2, %s267_s18  }
  0x67   : > { %s288_s17 = sand.u32 1, %s2031_s23   ;;  %s1466_s12 = sshll.u32 %s2059_s30, 8 }
  0x68   : > { %s1405_s20 = sshll.u32 %s288_s17, 4  ;;  %s296_s4 = scalar_lea.hbm %s2550_s1, %s1466_s12 }
  0x69   : > { %s290_s29 = scalar_lea.vmem [#allocation6], %s1405_s20  ;;  %s287_s3 = scalar_lea.sflag [#allocation7], %s286_s16 }
  0x6a   : > { %s297_s5 = sshll.u32 %s290_s29, 4  ;;  %p1905_p1 = pneg %p2306_p2  ;;  %s298_s5 = int_to_ptr.vmem [resolvable:$true] %s297_s5 }
  0x6b   : > { %s1916_s6 = scalar_lea.vmem %s298_s5, 256  ;;  %s2073_s13 = smov [#allocation6]  }
  0x6c   : > { %p1917_p4 = scmp.ne.s32.totalorder %s298_s5, %s1916_s6  ;;  %s1921_s27 = sshll.u32 %s2073_s13, 4  ;;  %s1922_s27 = int_to_ptr.vmem [resolvable:$false] %s1921_s27 }
  0x6d   : > { %s1923_s2 = scalar_lea.vmem %s1922_s27, 512  ;;  %p1924_p3 = scmp.lt.s32.totalorder %s298_s5, %s1922_s27 }
  0x6e   : > { %p1919_p9 = pnand %p1917_p4, %p1905_p1  ;;  %p1925_p12 = scmp.lt.s32.totalorder %s1923_s2, %s1916_s6 }
  0x70   : > { %p1920_p0 = pneg %p1919_p9  ;;  %p1926_p10 = por %p1925_p12, %p1924_p3 }
  0x72   : > { %p1927_p11 = pnand %p1926_p10, %p1920_p0 }
  0x74   : > { %1930 = shalt.err (!%p1927_p11)
}
  0x75   : > { %s2597_s0 = smov 8   ;;  %s2598_s29 = smov 128  }
  0x76   : > { %1625 = dma.hbm_to_vmem [thread:$0]  (!%p2306_p2), %s296_s4, 256, %s298_s5, %s287_s3, %s2598_s29, %s2598_s29, %s2597_s0  }
  0x77   : > { %315 = sbr.rel (%p2182_p5) target bundleno = 3193 (0xc79), region = 44  ;;  %s2330_s21 = sand.u32 (!%p2182_p5), 1, %s2039_s25  }
  0x78   : > { %s1409_s16 = sshll.u32 (!%p2182_p5), %s2330_s21, 3  ;;  %s318_s18 = scalar_lea.sflag (!%p2182_p5), [#allocation4], %s2330_s21 }
  0x79   : > { %s2334_s17 = scalar_lea.vmem (!%p2182_p5), [#allocation3], %s1409_s16 }
  0x7c   : > { %2002 = dma.done.wait (%p2260_p6), %s318_s18, 128  }
  0x7d   : > { %2004 = vsyncadd (%p2260_p6), %s318_s18, 4294967168  ;;  %s326_s5 = sand.u32 1, %s2170_s8   ;;  %s328_s10 = sand.u32 1, %s2027_s22  }
  0x7e   : > { %s2342_s19 = sshll.u32 %s328_s10, 4  ;;  %s327_s20 = scalar_lea.sflag [#allocation7], %s326_s5 }
  0x7f   : > { %s330_s12 = scalar_lea.vmem [#allocation6], %s2342_s19  ;;  %p2599_p5 = scmp.ne.s32.totalorder %s2577_s9, 0 }
  0x81   : > { %2006 = dma.done.wait (%p2599_p5), %s327_s20, 256  }
  0x82   : > { %2008 = vsyncadd (%p2599_p5), %s327_s20, 4294967040  ;;  %p2600_p2 = scmp.eq.s32.totalorder %s2170_s8, 0 }
  0x84   : > { %2010 = dma.done.wait (%p2600_p2), [#allocation7], 1024   ;;  %p2601_p6 = pmov %p2600_p2 }
  0x85   : > { %p2602_p8 = pmov %p2600_p2 }
  0x86   : > { %2012 = vsyncadd (%p2601_p6), [#allocation7], 4294966272 }
  0x87   : > { %2014 = dma.done.wait (%p2602_p8), [#allocation10], 3072   ;;  %p2603_p13 = pmov %p2600_p2 }
  0x88   : > { %p379_p7 = scmp.lt.s32.totalorder %s2051_s28, 1  ;;  %s2604_s4 = sld [smem:[#allocation26_spill]] }
  0x89   : > { %2016 = vsyncadd (%p2603_p13), [#allocation10], 4294964224  ;;  %s2365_s6 = scalar_lea.vmem [#allocation12], %s1409_s16  ;;  %s2605_s13 = sld [smem:[#allocation18_spill]] }
  0x8a   : > { %s2359_s15 = scalar_select %p379_p7, %s2051_s28, 1 }
  0x8e   : > { %s381_s3 = scalar_lea.vmem %s2604_s4, %s2359_s15 }
  0x8f   : > { %p1415_p1 = scmp.ne.s32.totalorder %s2605_s13, 0 }
  0x91   : > { %386 = sbr.rel (%p1415_p1) target bundleno = 385 (0x181), region = 68 }
  0x96   : > { %v1739_v0 = vld [vmem:[#allocation9 + $0x74] ss:$8 sps:$4 sm:$0xff]   ;;  %v1741_v1 = vld [vmem:[#allocation9 + $0x70] ss:$8 sps:$4 sm:$0xff]   ;;  %v2074_v2 = vmov 0  }
  0x97   : > { %518 = vmatprep.mubr.bf16.mxu0 %v2074_v2  ;;  %486 = vmatprep.subr.bf16.mxu0 %v1739_v0  ;;  %v1742_v3 = vld [vmem:[#allocation9 + $0x64] ss:$8 sps:$4 sm:$0xff]   ;;  %v1744_v4 = vld [vmem:[#allocation9 + $0x60] ss:$8 sps:$4 sm:$0xff]   ;;  %v1745_v5 = vld [vmem:[#allocation9 + $0x54] ss:$8 sps:$4 sm:$0xff]  }
  0x98   : > { %487 = vmatpush1.bf16.msra.mxu0 %v1741_v1  ;;  %v1747_v6 = vld [vmem:[#allocation9 + $0x50] ss:$8 sps:$4 sm:$0xff]   ;;  %v1748_v7 = vld [vmem:[#allocation9 + $0x44] ss:$8 sps:$4 sm:$0xff]   ;;  %v1750_v8 = vld [vmem:[#allocation9 + $0x40] ss:$8 sps:$4 sm:$0xff]  }
  0x99   : > { %488 = vmatprep.subr.bf16.mxu0 %v1742_v3  ;;  %v1751_v9 = vld [vmem:[#allocation9 + $0x34] ss:$8 sps:$4 sm:$0xff]   ;;  %v1753_v10 = vld [vmem:[#allocation9 + $0x30] ss:$8 sps:$4 sm:$0xff]   ;;  %v1754_v11 = vld [vmem:[#allocation9 + $0x24] ss:$8 sps:$4 sm:$0xff]  }
  0x9a   : > { %v1756_v12 = vld [vmem:[#allocation9 + $0x20] ss:$8 sps:$4 sm:$0xff]   ;;  %v1757_v13 = vld [vmem:[#allocation9 + $0x14] ss:$8 sps:$4 sm:$0xff]   ;;  %v1759_v14 = vld [vmem:[#allocation9 + $0x10] ss:$8 sps:$4 sm:$0xff]  }
  0x9b   : > { %v1760_v15 = vld [vmem:[#allocation9 + $0x4] ss:$8 sps:$4 sm:$0xff]   ;;  %v1762_v16 = vld [vmem:[#allocation9] ss:$8 sps:$4 sm:$0xff]  }
  0x9c   : > { %489 = vmatpush1.bf16.msra.mxu0 %v1744_v4  ;;  %v387_v17 = vld [vmem:[%s330_s12] sm:$0xff]  ;;  %v388_v18 = vld [vmem:[%s330_s12 + $0x8] sm:$0xff] }
  0x9d   : > { %490 = vmatprep.subr.bf16.mxu0 %v1745_v5  ;;  %v389_v19 = vpack.c.bf16 %v388_v18, %v387_v17 }
  0xa0   : > { %491 = vmatpush1.bf16.msra.mxu0 %v1747_v6 }
  0xa1   : > { %492 = vmatprep.subr.bf16.mxu0 %v1748_v7 }
  0xa4   : > { %493 = vmatpush1.bf16.msra.mxu0 %v1750_v8 }
  0xa5   : > { %494 = vmatprep.subr.bf16.mxu0 %v1751_v9 }
  0xa8   : > { %495 = vmatpush1.bf16.msra.mxu0 %v1753_v10 }
  0xa9   : > { %496 = vmatprep.subr.bf16.mxu0 %v1754_v11 }
  0xac   : > { %497 = vmatpush1.bf16.msra.mxu0 %v1756_v12 }
  0xad   : > { %498 = vmatprep.subr.bf16.mxu0 %v1757_v13 }
  0xb0   : > { %499 = vmatpush1.bf16.msra.mxu0 %v1759_v14 }
  0xb1   : > { %500 = vmatprep.subr.bf16.mxu0 %v1760_v15 }
  0xb4   : > { %501 = vmatpush1.bf16.msra.mxu0 %v1762_v16 }
  0xb7   : > { %519 = vmatmul.mubr.bf16.vlgmr.msra.gmra.mxu0 %v389_v19 }
 0x177   : > { %v520_v20 = vpop.f32.mrf.mxu0 }
 0x179   : > { %v522_v21 = vpop.f32.mrf.mxu0 }
 0x17a   : > { %v1467_v22 = vpack.c.bf16 %v522_v21, %v520_v20 }
 0x17b   : > { %v524_v23 = vpop.f32.mrf.mxu0 }
 0x17c   : > { %541 = vst [vmem:[#allocation2] sm:$0xff] %v1467_v22 }
 0x17d   : > { %v526_v24 = vpop.f32.mrf.mxu0 }
 0x17e   : > { %v1468_v25 = vpack.c.bf16 %v526_v24, %v524_v23 }
 0x180   : > { %542 = vst [vmem:[#allocation2 + $0x8] sm:$0xff] %v1468_v25 }
 0x181 PF: > { %v1763_v26 = vld [vmem:[#allocation8 + $0x38] sm:$0xff]   ;;  %v2075_v27 = vmov 0.0   ;;  %v1764_v28 = vld [vmem:[#allocation8 + $0x30] sm:$0xff]   ;;  %vm2076_vm0 = vmmov 0   ;;  %v1765_v29 = vld [vmem:[#allocation8 + $0x28] sm:$0xff]   ;;  %vm677_vm1 = vcmask 261120   ;;  %v654_v44 = vlaneseq }
 0x182   : > { %1503 = vmatprep.subr.bf16.mxu0 %v2075_v27  ;;  %1523 = vmatprep.subr.bf16.mxu1 %v2075_v27  ;;  %v1766_v30 = vld [vmem:[#allocation8 + $0x20] sm:$0xff]   ;;  %s2077_s8 = smov 96   ;;  %v1767_v33 = vld [vmem:[#allocation8 + $0x18] sm:$0xff]   ;;  %v1768_v34 = vld [vmem:[#allocation8 + $0x10] sm:$0xff]   ;;  %s2606_s27 = sld [smem:[#allocation18_spill]]  ;;  %vm724_vm4 = vcmask 130048  }
 0x183   : > { %1504 = vmatpush3.bf16.msra.mxu0 %v1763_v26  ;;  %1519 = vmatprep.mubr.msk.bf16.mxu0 %vm2076_vm0, %v2075_v27  ;;  %v1769_v35 = vld [vmem:[#allocation8 + $0x8] sm:$0xff]   ;;  %v1770_v36 = vld [vmem:[#allocation8] sm:$0xff]   ;;  %v543_v37 = vld [vmem:[%s2334_s17] sm:$0xff]  ;;  %v655_v46 = vshrl.u32 %v654_v44, 7  ;;  %v665_v51 = vand.u32 127, %v654_v44  ;;  %s2078_s18 = smov 64  }
 0x184   : > { %1505 = vmatprep.subr.bf16.mxu0 %v2075_v27  ;;  %1525 = vmatprep.mubr.msk.bf16.mxu1 %vm2076_vm0, %v2075_v27  ;;  %v544_v38 = vpack.c.bf16 %v543_v37, %v543_v37  ;;  %v650_v45 = vld [vmem:[%s381_s3] sm:$0x1]  ;;  %s2079_s17 = smov 32   ;;  %vm1124_vm5 = vcmask 523264   ;;  %vm1126_vm6 = vcmask 785408   ;;  %s2608_s5 = sld [smem:[#allocation22_spill]] }
 0x185   : > { %vm651_vm2 = vcmp.ne.s32.totalorder %v650_v45, 0  ;;  %v656_v48 = vsub.s32 0, %v655_v46  ;;  %s1462_s10 = sshll.u32 %s2051_s28, 1  ;;  %s1250_s12 = sshll.u32 %s2365_s6, 4  ;;  %s2488_s12 = int_to_ptr.vmem [resolvable:$true] %s1250_s12 }
 0x186   : > { %v652_v49 = vsel %vm651_vm2, -1e+30, %v2075_v27  ;;  %s2609_s14 = sld [smem:[#allocation30_spill]]  ;;  %s1235_s3 = scalar_lea.sflag [#allocation5], %s2330_s21 }
 0x187   : > { %1506 = vmatpush3.bf16.msra.mxu0 %v1764_v28  ;;  %v2380_v31 = vld [vmem:[#allocation2] ss:$8 sps:$4 sm:$0xff]   ;;  %v657_v52 = vrot.slane %v652_v49, %v656_v48  ;;  %v2416_v1 = vld [vmem:[#allocation2 + $0x4] ss:$8 sps:$4 sm:$0xff]   ;;  %s1931_s13 = scalar_lea.vmem %s2488_s12, 128  ;;  %s2080_s28 = smov [#allocation12]  }
 0x188   : > { %1507 = vmatprep.subr.bf16.mxu0 %v2075_v27  ;;  %v682_v32 = vsel %vm677_vm1, %v2380_v31, 0  ;;  %789 = vrot.lane.b32.xlu1 %v2380_v31, %s2077_s8  ;;  %s1442_s16 = sshll.u32 %s2606_s27, 3  ;;  %s1246_s19 = sadd.s32 %s2606_s27, %s1462_s10 }
 0x189   : > { %1524 = vmatpush3.bf16.xpose.msra.mxu1 %v682_v32  ;;  %v662_v47 = vstv %s1442_s16  ;;  %s1463_s20 = sshll.u32 %s1246_s19, 7  ;;  %p1932_p4 = scmp.ne.s32.totalorder %s2488_s12, %s1931_s13 }
 0x18a   : > { %1529 = vmatprep.subr.bf16.mxu1 %v2075_v27  ;;  %v663_v50 = vadd.s32 %v662_v47, %v655_v46  ;;  %p2610_p9 = scmp.ne.s32.totalorder %s2608_s5, 0 }
 0x18b   : > { %1508 = vmatpush3.bf16.msra.mxu0 %v1765_v29 }
 0x18c   : > { %1509 = vmatprep.subr.bf16.mxu0 %v2075_v27  ;;  %vm666_vm3 = vcmp.gt.s32.totalorder %v665_v51, %v663_v50  ;;  %s2486_s4 = scalar_lea.hbm %s2609_s14, %s1463_s20  ;;  %p1933_p0 = pnand %p1932_p4, %p2610_p9 }
 0x18d   : > { %v2411_v53 = vsel %vm666_vm3, -1e+30, %v657_v52 }
 0x18e   : > { %p1934_p3 = pneg %p1933_p0 }
 0x18f   : > { %1510 = vmatpush3.bf16.msra.mxu0 %v1766_v30 }
 0x190   : > { %1511 = vmatprep.subr.bf16.mxu0 %v2075_v27 }
 0x193   : > { %1512 = vmatpush3.bf16.msra.mxu0 %v1767_v33 }
 0x194   : > { %1513 = vmatprep.subr.bf16.mxu0 %v2075_v27 }
 0x197   : > { %1514 = vmatpush3.bf16.msra.mxu0 %v1768_v34 }
 0x198   : > { %1515 = vmatprep.subr.bf16.mxu0 %v2075_v27 }
 0x19b   : > { %1516 = vmatpush3.bf16.msra.mxu0 %v1769_v35 }
 0x19c   : > { %1517 = vmatprep.subr.bf16.mxu0 %v2075_v27 }
 0x19f   : > { %1518 = vmatpush3.bf16.msra.mxu0 %v1770_v36 }
 0x1a0   : > { %1571 = vmatprep.subr.bf16.mxu0 %v2075_v27 }
 0x1a2   : > { %1520 = vmatmul.mubr.bf16.vlgmr.msra.gmra.mxu0 %v544_v38 }
 0x1a3   : > { %1587 = vmatprep.mubr.msk.bf16.mxu0 %vm2076_vm0, %v2075_v27 }
 0x1fa   : > { %v790_v5 = vpop.permute.xlu1 %789 }
 0x1fb   : > { %v795_v6 = vsel %vm677_vm1, %v790_v5, 0 }
 0x262   : > { %v643_v39 = vpop.f32.mrf.mxu0 }
 0x263   : > { %v2396_v40 = vpack.c.bf16 %v643_v39, %v643_v39 }
 0x264   : > { %v1521_v41 = vpop.f32.mrf.mxu0 }
 0x265   : > { %787 = vrot.lane.b32.xlu1 %v2396_v40, %s2077_s8  ;;  %1526 = vmatmul.mubr.msk.bf16.vlgmr.msra.gmra.mxu1 %vm677_vm1, %v2396_v40 }
 0x266   : > { %v646_v42 = vpop.f32.mrf.mxu0  ;;  %1531 = vmatprep.mubr.msk.bf16.mxu1 %vm2076_vm0, %v2075_v27  ;;  %1530 = vmatpush3.bf16.msra.mxu1 %v2416_v1 }
 0x267   : > { %1535 = vmatprep.subr.bf16.mxu1 %v2075_v27 }
 0x268   : > { %v1522_v43 = vpop.f32.mrf.mxu0 }
 0x2d7   : > { %v788_v8 = vpop.permute.xlu1 %787 }
 0x325   : > { %v718_v54 = vpop.f32.mrf.mxu1 }
 0x326   : > { %v719_v55 = vadd.f32 %v718_v54, %v2411_v53 }
 0x327   : > { %v1527_v56 = vpop.f32.mrf.mxu1 }
 0x328   : > { %v725_v57 = vsel %vm724_vm4, %v719_v55, -inf }
 0x329   : > { %726 = vmax.xlane.f32.xlu0 %v725_v57  ;;  %v721_v58 = vpop.f32.mrf.mxu1 }
 0x32b   : > { %v1528_v59 = vpop.f32.mrf.mxu1 }
 0x3b2   : > { %v727_v60 = vpop.xlane.xlu0 %726 }
 0x3b3   : > { %v728_v61 = vsub.f32 %v719_v55, %v727_v60 }
 0x3b5   : > { %v729_v62 = vmul.f32 1.442695, %v728_v61 }
 0x3b7   : > { %1781 = vpow2.f32 %v729_v62 }
 0x3c4   : > { %v1782_v63 = vpop.eup %1781 }
 0x3c5   : > { %v731_v0 = vsel %vm724_vm4, %v1782_v63, 0.0 }
 0x3c6   : > { %732 = vadd.xlane.f32.xlu0 %v731_v0 }
 0x44f   : > { %v733_v2 = vpop.xlane.xlu0 %732 }
 0x450   : > { %1783 = vrcp.f32 %v733_v2 }
 0x45d   : > { %v1784_v3 = vpop.eup %1783 }
 0x45e   : > { %v735_v4 = vmul.f32 %v1784_v3, %v1782_v63 }
 0x460   : > { %v736_v7 = vpack.c.bf16 %v735_v4, %v735_v4 }
 0x462   : > { %1532 = vmatmul.mubr.msk.bf16.vlgmr.msra.gmra.mxu1 %vm724_vm4, %v736_v7 }
 0x463   : > { %1536 = vmatpush3.bf16.xpose.msra.mxu1 %v795_v6  ;;  %1537 = vmatprep.mubr.msk.bf16.mxu1 %vm2076_vm0, %v2075_v27 }
 0x464   : > { %1541 = vmatprep.subr.bf16.mxu1 %v2075_v27 }
 0x46a   : > { %1538 = vmatmul.mubr.msk.bf16.vlgmr.msra.gmra.mxu1 %vm677_vm1, %v788_v8 }
 0x46b   : > { %1543 = vmatprep.mubr.msk.bf16.mxu1 %vm2076_vm0, %v2075_v27 }
 0x522   : > { %v2428_v9 = vpop.f32.mrf.mxu1 }
 0x524   : > { %v1533_v10 = vpop.f32.mrf.mxu1 }
 0x526   : > { %v783_v11 = vpop.f32.mrf.mxu1 }
 0x528   : > { %v1534_v12 = vpop.f32.mrf.mxu1 }
 0x52a   : > { %v831_v13 = vpop.f32.mrf.mxu1 }
 0x52b   : > { %v832_v14 = vadd.f32 %v831_v13, %v2411_v53 }
 0x52c   : > { %v1539_v15 = vpop.f32.mrf.mxu1 }
 0x52d   : > { %v837_v16 = vsel %vm724_vm4, %v832_v14, -inf  ;;  %v1775_v15 = vld [vmem:[#allocation11 + $0x28] sm:$0xff]  }
 0x52e   : > { %838 = vmax.xlane.f32.xlu0 %v837_v16  ;;  %v834_v17 = vpop.f32.mrf.mxu1  ;;  %v1776_v16 = vld [vmem:[#allocation11 + $0x20] sm:$0xff]  }
 0x52f   : > { %v1777_v17 = vld [vmem:[#allocation11 + $0x18] sm:$0xff]  }
 0x530   : > { %v1540_v18 = vpop.f32.mrf.mxu1 }
 0x531   : > { %v1778_v18 = vld [vmem:[#allocation11 + $0x10] sm:$0xff]  }
 0x544   : > { %849 = vrot.lane.b32.xlu0 %v2416_v1, %s2077_s8 }
 0x548   : > { %897 = vrot.lane.b32.xlu0 %v2380_v31, %s2078_s18 }
 0x54c   : > { %895 = vrot.lane.b32.xlu0 %v2396_v40, %s2078_s18 }
 0x5b7   : > { %v839_v19 = vpop.xlane.xlu0 %838 }
 0x5b8   : > { %v840_v20 = vsub.f32 %v832_v14, %v839_v19  ;;  %v1774_v14 = vld [vmem:[#allocation11 + $0x30] sm:$0xff]   ;;  %v1779_v19 = vld [vmem:[#allocation11 + $0x8] sm:$0xff]  }
 0x5ba   : > { %v841_v21 = vmul.f32 1.442695, %v840_v20  ;;  %v1780_v20 = vld [vmem:[#allocation11] sm:$0xff]  }
 0x5bb   : > { %v850_v22 = vpop.permute.xlu0 %849 }
 0x5bc   : > { %1785 = vpow2.f32 %v841_v21  ;;  %1542 = vmatpush3.bf16.msra.mxu1 %v850_v22 }
 0x5bd   : > { %1547 = vmatprep.subr.bf16.mxu1 %v2075_v27 }
 0x5bf   : > { %v898_v29 = vpop.permute.xlu0 %897 }
 0x5c0   : > { %v903_v30 = vsel %vm677_vm1, %v898_v29, 0 }
 0x5c3   : > { %v896_v33 = vpop.permute.xlu0 %895 }
 0x5c9   : > { %v1786_v23 = vpop.eup %1785 }
 0x5ca   : > { %v843_v24 = vsel %vm724_vm4, %v1786_v23, 0.0 }
 0x5cb   : > { %844 = vadd.xlane.f32.xlu1 %v843_v24 }
 0x5dc   : > { %957 = vrot.lane.b32.xlu1 %v2416_v1, %s2078_s18 }
 0x654   : > { %v845_v25 = vpop.xlane.xlu1 %844 }
 0x655   : > { %1787 = vrcp.f32 %v845_v25 }
 0x658   : > { %v958_v45 = vpop.permute.xlu1 %957 }
 0x662   : > { %v1788_v26 = vpop.eup %1787 }
 0x663   : > { %v847_v28 = vmul.f32 %v1788_v26, %v1786_v23 }
 0x665   : > { %v848_v32 = vpack.c.bf16 %v847_v28, %v847_v28 }
 0x667   : > { %1544 = vmatmul.mubr.msk.bf16.vlgmr.msra.gmra.mxu1 %vm724_vm4, %v848_v32 }
 0x668   : > { %1548 = vmatpush3.bf16.xpose.msra.mxu1 %v903_v30  ;;  %1549 = vmatprep.mubr.msk.bf16.mxu1 %vm2076_vm0, %v2075_v27 }
 0x669   : > { %1553 = vmatprep.subr.bf16.mxu1 %v2075_v27 }
 0x66f   : > { %1550 = vmatmul.mubr.msk.bf16.vlgmr.msra.gmra.mxu1 %vm677_vm1, %v896_v33 }
 0x670   : > { %1555 = vmatprep.mubr.msk.bf16.mxu1 %vm2076_vm0, %v2075_v27  ;;  %1554 = vmatpush3.bf16.msra.mxu1 %v958_v45 }
 0x671   : > { %1559 = vmatprep.subr.bf16.mxu1 %v2075_v27 }
 0x727   : > { %v889_v34 = vpop.f32.mrf.mxu1 }
 0x729   : > { %v1545_v35 = vpop.f32.mrf.mxu1 }
 0x72b   : > { %v892_v36 = vpop.f32.mrf.mxu1 }
 0x72d   : > { %v1546_v37 = vpop.f32.mrf.mxu1 }
 0x72f   : > { %v939_v38 = vpop.f32.mrf.mxu1 }
 0x730   : > { %v940_v39 = vadd.f32 %v939_v38, %v2411_v53 }
 0x731   : > { %v1551_v41 = vpop.f32.mrf.mxu1 }
 0x732   : > { %v945_v42 = vsel %vm724_vm4, %v940_v39, -inf }
 0x733   : > { %946 = vmax.xlane.f32.xlu0 %v945_v42  ;;  %v942_v43 = vpop.f32.mrf.mxu1 }
 0x735   : > { %v1552_v44 = vpop.f32.mrf.mxu1 }
 0x7bc   : > { %v947_v46 = vpop.xlane.xlu0 %946 }
 0x7bd   : > { %v948_v47 = vsub.f32 %v940_v39, %v947_v46 }
 0x7bf   : > { %v949_v48 = vmul.f32 1.442695, %v948_v47 }
 0x7c1   : > { %1789 = vpow2.f32 %v949_v48 }
 0x7ce   : > { %v1790_v49 = vpop.eup %1789 }
 0x7cf   : > { %v951_v50 = vsel %vm724_vm4, %v1790_v49, 0.0 }
 0x7d0   : > { %952 = vadd.xlane.f32.xlu1 %v951_v50 }
 0x7e1   : > { %1005 = vrot.lane.b32.xlu1 %v2380_v31, %s2079_s17 }
 0x7e5   : > { %1003 = vrot.lane.b32.xlu1 %v2396_v40, %s2079_s17 }
 0x859   : > { %v953_v51 = vpop.xlane.xlu1 %952 }
 0x85a   : > { %1791 = vrcp.f32 %v953_v51 }
 0x85d   : > { %v1006_v55 = vpop.permute.xlu1 %1005 }
 0x85e   : > { %v1011_v56 = vsel %vm677_vm1, %v1006_v55, 0 }
 0x861   : > { %v1004_v58 = vpop.permute.xlu1 %1003 }
 0x867   : > { %v1792_v52 = vpop.eup %1791 }
 0x868   : > { %v955_v54 = vmul.f32 %v1792_v52, %v1790_v49 }
 0x86a   : > { %v956_v57 = vpack.c.bf16 %v955_v54, %v955_v54 }
 0x86c   : > { %1556 = vmatmul.mubr.msk.bf16.vlgmr.msra.gmra.mxu1 %vm724_vm4, %v956_v57 }
 0x86d   : > { %1560 = vmatpush3.bf16.xpose.msra.mxu1 %v1011_v56  ;;  %1561 = vmatprep.mubr.msk.bf16.mxu1 %vm2076_vm0, %v2075_v27 }
 0x86e   : > { %1565 = vmatprep.subr.bf16.mxu1 %v2075_v27 }
 0x874   : > { %1562 = vmatmul.mubr.msk.bf16.vlgmr.msra.gmra.mxu1 %vm677_vm1, %v1004_v58 }
 0x875   : > { %1567 = vmatprep.mubr.msk.bf16.mxu1 %vm2076_vm0, %v2075_v27 }
 0x92c   : > { %v997_v31 = vpop.f32.mrf.mxu1 }
 0x92e   : > { %v1557_v40 = vpop.f32.mrf.mxu1 }
 0x930   : > { %v1000_v59 = vpop.f32.mrf.mxu1 }
 0x932   : > { %v1558_v60 = vpop.f32.mrf.mxu1 }
 0x934   : > { %v1047_v61 = vpop.f32.mrf.mxu1 }
 0x935   : > { %v1048_v62 = vadd.f32 %v1047_v61, %v2411_v53 }
 0x936   : > { %v1563_v63 = vpop.f32.mrf.mxu1 }
 0x937   : > { %v1053_v0 = vsel %vm724_vm4, %v1048_v62, -inf }
 0x938   : > { %1054 = vmax.xlane.f32.xlu0 %v1053_v0  ;;  %v1050_v2 = vpop.f32.mrf.mxu1 }
 0x93a   : > { %v1564_v3 = vpop.f32.mrf.mxu1 }
 0x94e   : > { %1065 = vrot.lane.b32.xlu0 %v2416_v1, %s2079_s17  ;;  %v1773_v1 = vld [vmem:[#allocation11 + $0x38] sm:$0xff]  }
 0x94f   : > { %1572 = vmatpush3.bf16.msra.mxu0 %v1773_v1 }
 0x950   : > { %1573 = vmatprep.subr.bf16.mxu0 %v2075_v27 }
 0x952   : > { %1112 = vrot.lane.b32.xlu0 %v889_v34, %s2079_s17 }
 0x953   : > { %1574 = vmatpush3.bf16.msra.mxu0 %v1774_v14 }
 0x954   : > { %1575 = vmatprep.subr.bf16.mxu0 %v2075_v27 }
 0x956   : > { %1116 = vrot.lane.b32.xlu0 %v997_v31, %s2078_s18 }
 0x957   : > { %1576 = vmatpush3.bf16.msra.mxu0 %v1775_v15 }
 0x958   : > { %1577 = vmatprep.subr.bf16.mxu0 %v2075_v27 }
 0x95b   : > { %1578 = vmatpush3.bf16.msra.mxu0 %v1776_v16 }
 0x95c   : > { %1579 = vmatprep.subr.bf16.mxu0 %v2075_v27 }
 0x95f   : > { %1580 = vmatpush3.bf16.msra.mxu0 %v1777_v17 }
 0x960   : > { %1581 = vmatprep.subr.bf16.mxu0 %v2075_v27 }
 0x963   : > { %1582 = vmatpush3.bf16.msra.mxu0 %v1778_v18 }
 0x964   : > { %1583 = vmatprep.subr.bf16.mxu0 %v2075_v27 }
 0x967   : > { %1584 = vmatpush3.bf16.msra.mxu0 %v1779_v19 }
 0x968   : > { %1585 = vmatprep.subr.bf16.mxu0 %v2075_v27 }
 0x96b   : > { %1586 = vmatpush3.bf16.msra.mxu0 %v1780_v20 }
 0x9c1   : > { %v1055_v4 = vpop.xlane.xlu0 %1054 }
 0x9c2   : > { %v1056_v5 = vsub.f32 %v1048_v62, %v1055_v4 }
 0x9c4   : > { %v1057_v6 = vmul.f32 1.442695, %v1056_v5 }
 0x9c5   : > { %v1066_v7 = vpop.permute.xlu0 %1065 }
 0x9c6   : > { %1793 = vpow2.f32 %v1057_v6  ;;  %1566 = vmatpush3.bf16.msra.mxu1 %v1066_v7 }
 0x9c9   : > { %v1113_v25 = vpop.permute.xlu0 %1112 }
 0x9ca   : > { %v1123_v27 = vsel %vm677_vm1, %v2428_v9, %v1113_v25 }
 0x9cd   : > { %v1117_v26 = vpop.permute.xlu0 %1116 }
 0x9ce   : > { %v1125_v28 = vsel %vm1124_vm5, %v1123_v27, %v1117_v26 }
 0x9d3   : > { %v1794_v8 = vpop.eup %1793 }
 0x9d4   : > { %v1059_v53 = vsel %vm724_vm4, %v1794_v8, 0.0 }
 0x9d5   : > { %1060 = vadd.xlane.f32.xlu1 %v1059_v53 }
 0xa5e   : > { %v1061_v10 = vpop.xlane.xlu1 %1060 }
 0xa5f   : > { %1795 = vrcp.f32 %v1061_v10 }
 0xa6c   : > { %v1796_v11 = vpop.eup %1795 }
 0xa6d   : > { %v1063_v12 = vmul.f32 %v1796_v11, %v1794_v8 }
 0xa6f   : > { %v1064_v13 = vpack.c.bf16 %v1063_v12, %v1063_v12 }
 0xa71   : > { %1568 = vmatmul.mubr.msk.bf16.vlgmr.msra.gmra.mxu1 %vm724_vm4, %v1064_v13 }
 0xb31   : > { %v1105_v21 = vpop.f32.mrf.mxu1 }
 0xb32   : > { %1120 = vrot.lane.b32.xlu0 %v1105_v21, %s2077_s8  ;;  %s1935_s8 = sshll.u32 %s2080_s28, 4  ;;  %s1936_s8 = int_to_ptr.vmem [resolvable:$false] %s1935_s8 }
 0xb33   : > { %v1569_v22 = vpop.f32.mrf.mxu1  ;;  %s1937_s27 = scalar_lea.vmem %s1936_s8, 256  ;;  %p1938_p12 = scmp.lt.s32.totalorder %s2488_s12, %s1936_s8 }
 0xb34   : > { %p1939_p10 = scmp.lt.s32.totalorder %s1937_s27, %s1931_s13 }
 0xb35   : > { %v1108_v23 = vpop.f32.mrf.mxu1 }
 0xb36   : > { %p1940_p11 = por %p1939_p10, %p1938_p12 }
 0xb37   : > { %v1570_v24 = vpop.f32.mrf.mxu1 }
 0xb38   : > { %p1941_p5 = pnand %p1940_p11, %p1934_p3 }
 0xba4   : > { %v1121_v29 = vpop.permute.xlu0 %1120 }
 0xba5   : > { %v1127_v30 = vsel %vm1126_vm6, %v1125_v28, %v1121_v29 }
 0xba6   : > { %v1128_v32 = vpack.c.bf16 %v1127_v30, %v1127_v30 }
 0xba8   : > { %1588 = vmatmul.mubr.bf16.vlgmr.msra.gmra.mxu0 %v1128_v32 }
 0xc68   : > { %v1227_v9 = vpop.f32.mrf.mxu0 }
 0xc69   : > { %1233 = vst [vmem:[%s2365_s6] sm:$0xff] %v1227_v9 }
 0xc6a   : > { %v1589_v33 = vpop.f32.mrf.mxu0 }
 0xc6b   : > { %1944 = shalt.err (!%p1941_p5)
}
 0xc6c   : > { %s1945_s6 = scalar_lea.hbm %s2486_s4, 128  ;;  %s1949_s0 = scalar_lea.hbm %s2609_s14, 512 }
 0xc6d   : > { %p1946_p2 = scmp.ne.s32.totalorder %s2486_s4, %s1945_s6  ;;  %p1950_p13 = scmp.lt.s32.totalorder %s2486_s4, %s2609_s14 }
 0xc6e   : > { %p1951_p7 = scmp.lt.s32.totalorder %s1949_s0, %s1945_s6 }
 0xc6f   : > { %p1947_p6 = pnand %p1946_p2, %p2610_p9 }
 0xc70   : > { %p1952_p1 = por %p1951_p7, %p1950_p13 }
 0xc71   : > { %p1948_p8 = pneg %p1947_p6 }
 0xc73   : > { %p1953_p4 = pnand %p1952_p1, %p1948_p8 }
 0xc75   : > { %1956 = shalt.err (!%p1953_p4)
}
 0xc76   : > { %1607 = dma.vmem_to_hbm [thread:$0]  (%p2610_p9), %s2488_s12, 128, %s2486_s4, %s1235_s3   ;;  %v1230_v34 = vpop.f32.mrf.mxu0 }
 0xc78   : > { %v1590_v35 = vpop.f32.mrf.mxu0 }
 0xc79 PF: > { %p1637_p0 = scmp.ge.s32.totalorder %s2063_s7, 2  ;;  %s1262_s18 = sand.u32 1, %s2035_s24  }
 0xc7a   : > { %p2611_p3 = scmp.ne.s32.totalorder %s2593_s11, 0  ;;  %s1263_s17 = scalar_lea.sflag [#allocation5], %s1262_s18 }
 0xc7c   : > { %p1627_p12 = pnand %p1637_p0, %p2611_p3 }
 0xc7e   : > { %p1628_p10 = pneg %p1627_p12 }
 0xc80   : > { %2018 = dma.done.wait (%p1628_p10), %s1263_s17, 128  }
 0xc81   : > { %2020 = vsyncadd (%p1628_p10), %s1263_s17, 4294967168  ;;  %s26_s7 = sadd.s32 1, %s2063_s7   ;;  %s2612_s5 = sld [smem:[#allocation23_spill]] }
 0xc82   : > { %p23_p11 = scmp.ge.s32.totalorder %s26_s7, 6   ;;  %s2613_s10 = sld [smem:[#allocation24_spill]] }
 0xc83   : > { %s2614_s27 = sld [smem:[#allocation19_spill]]  ;;  %s2617_s21 = smov %s2027_s22 }
 0xc84   : > { %s2615_s29 = sld [smem:[#allocation20_spill]]  ;;  %s2618_s22 = smov %s2031_s23 }
 0xc85   : > { %s2616_s19 = sld [smem:[#allocation21_spill]]  ;;  %s2620_s24 = smov %s2039_s25 }
 0xc86   : > { %s2621_s25 = smov %s2043_s26  ;;  %s2623_s28 = smov %s2059_s30 }
 0xc87   : > { %s2619_s23 = smov %s2612_s5  ;;  %25 = sbr.rel (!%p23_p11) target bundleno = 19 (0x13), region = 121 }
 0xc88   : > { %s2622_s26 = smov %s2613_s10 }
 0xc8b   : > { %s2624_s30 = smov %s2616_s19 }
 0xc8c   :  { %1268 = vsyncpa [#allocation4], 1 }
 0xc8d   :  { %1270 = vsyncpa [#allocation4 + $0x1], 1 }
 0xc8e   :  { %1271 = vsyncpa [#allocation7], 1 }
 0xc8f   :  { %1273 = vsyncpa [#allocation7 + $0x1], 1 }
 0xc90   :  { %1274 = vsyncpa [#allocation10], 1 }
 0xc91   :  { %1275 = vsyncpa [#allocation5], 1 }
 0xc92   :  { %1277 = vsyncpa [#allocation5 + $0x1], 1 }

</bundles_post_ra>
